<compile_context>
chip_gen: v6e
topology: v6e:2x2x1
jax: 0.10.0
libtpu: 0.0.40
codegen_flags: <defaults>
</compile_context>

<pallas_src>
import functools

import jax
import jax.numpy as jnp
from jax.experimental import pallas as pl
from jax.experimental.pallas import tpu as pltpu


# ----------------------------------------------------------------------------
# Helpers
# ----------------------------------------------------------------------------
def _layer_norm(x, gamma, beta, eps=1e-5):
    mean = jnp.mean(x, axis=-1, keepdims=True)
    var = jnp.mean((x - mean) ** 2, axis=-1, keepdims=True)
    return (x - mean) * jax.lax.rsqrt(var + eps) * gamma + beta


# ----------------------------------------------------------------------------
# Pallas kernel: the WHOLE encoder stack.
# grid = (batch_blocks, num_layers); out_ref is the layer-carried activation.
# ----------------------------------------------------------------------------
def encoder_stack_kernel(
    x_ref,
    wqkv_ref, bqkv_ref, wo_ref, bo_ref,
    ln1_g_ref, ln1_b_ref,
    w1_ref, b1_ref, w2_ref, b2_ref,
    ln2_g_ref, ln2_b_ref,
    out_ref,
    ctx_ref,                       # VMEM scratch: [M, D] bf16 per-head context slab
    *,
    num_heads: int,
    seq_len: int,
):
    layer = pl.program_id(1)

    # Initialize the resident output block from the input once per batch block.
    @pl.when(layer == 0)
    def _():
        out_ref[...] = x_ref[...]

    x = out_ref[...]                                   # [M, D] f32, M = bb * S
    M, D = x.shape
    S = seq_len
    bb = M // S
    dh = D // num_heads
    scale = 1.0 / (dh ** 0.5)

    # --- fused QKV projection (bf16 in, f32 accumulate) ----------------------
    x_bf = x.astype(jnp.bfloat16)
    qkv = jnp.dot(x_bf, wqkv_ref[...],
                  preferred_element_type=jnp.float32) + bqkv_ref[...]   # [M, 3D]
    qkv3 = qkv.reshape(bb, S, 3 * D)                   # per-sequence view
    q3 = qkv3[..., :D] * scale                         # pre-scale q in f32
    k3 = qkv3[..., D:2 * D]
    v3 = qkv3[..., 2 * D:]

    # --- multi-head self-attention, per-sequence (no mask needed) ------------
    # Heads processed one at a time (demo has 4 heads / dh=8); at real sizes
    # group heads so lane slices are >=128 wide.
    for h in range(num_heads):
        sl = slice(h * dh, (h + 1) * dh)
        qh = q3[..., sl].astype(jnp.bfloat16)          # [bb, S, dh]
        kh = k3[..., sl].astype(jnp.bfloat16)
        vh = v3[..., sl].astype(jnp.bfloat16)
        s = jnp.einsum('bqd,bkd->bqk', qh, kh,
                       preferred_element_type=jnp.float32)              # [bb, S, S]
        s_max = jnp.max(s, axis=-1, keepdims=True)
        e = jnp.exp(s - s_max)
        p = e / jnp.sum(e, axis=-1, keepdims=True)     # exact softmax normalization
        ctx_h = jnp.einsum('bqk,bkd->bqd', p.astype(jnp.bfloat16), vh,
                           preferred_element_type=jnp.float32)          # [bb, S, dh]
        ctx_ref[:, sl] = ctx_h.reshape(M, dh).astype(jnp.bfloat16)

    # Single full-depth output projection: [M,D] x [D,D].
    attn = jnp.dot(ctx_ref[...], wo_ref[...],
                   preferred_element_type=jnp.float32) + bo_ref[...]

    y = _layer_norm(x + attn, ln1_g_ref[...], ln1_b_ref[...])

    # --- position-wise feed-forward ------------------------------------------
    h1 = jnp.dot(y.astype(jnp.bfloat16), w1_ref[...],
                 preferred_element_type=jnp.float32) + b1_ref[...]
    h1 = jnp.maximum(h1, 0.0)                          # ReLU
    h2 = jnp.dot(h1.astype(jnp.bfloat16), w2_ref[...],
                 preferred_element_type=jnp.float32) + b2_ref[...]

    out_ref[...] = _layer_norm(y + h2, ln2_g_ref[...], ln2_b_ref[...])


# ----------------------------------------------------------------------------
# Wrapper: a single pallas_call for the whole stack.
# ----------------------------------------------------------------------------
_STACK_PARAM_ORDER = (
    "wqkv", "bqkv", "wo", "bo", "ln1_g", "ln1_b",
    "w1", "b1", "w2", "b2", "ln2_g", "ln2_b",
)


def encoder_stack(x_flat, params, num_heads, seq_len, batch, seqs_per_block=None):
    N, D = x_flat.shape
    assert N == batch * seq_len

    if seqs_per_block is None:
        # Aim for a few hundred tokens per block; must divide the batch.
        seqs_per_block = min(batch, max(1, 256 // max(seq_len, 1)))
        while batch % seqs_per_block:
            seqs_per_block -= 1
    assert batch % seqs_per_block == 0
    num_batch_blocks = batch // seqs_per_block
    M = seqs_per_block * seq_len                       # tokens per grid step
    assert (M % 8 == 0) or (num_batch_blocks == 1), "block sublane dim must be 8-aligned"

    weights = [params[name] for name in _STACK_PARAM_ORDER]
    num_layers = weights[0].shape[0]

    def wspec(w):
        # Squeeze the leading layer axis; DMA only layer l's slice each grid step
        # (default double-buffering prefetches layer l+1 while computing layer l).
        nd = w.ndim
        return pl.BlockSpec((None,) + w.shape[1:],
                            lambda b, l, nd=nd: (l,) + (0,) * (nd - 1))

    in_specs = [pl.BlockSpec((M, D), lambda b, l: (b, 0))]   # fetched once per batch block
    in_specs += [wspec(w) for w in weights]
    # Output block index is constant along the layer axis -> it stays resident in
    # VMEM across layers (it IS the carried activation) and is written back to HBM
    # once per batch block.
    out_specs = pl.BlockSpec((M, D), lambda b, l: (b, 0))

    kernel = functools.partial(encoder_stack_kernel,
                               num_heads=num_heads, seq_len=seq_len)
    return pl.pallas_call(
        kernel,
        out_shape=jax.ShapeDtypeStruct((N, D), jnp.float32),
        grid=(num_batch_blocks, num_layers),
        in_specs=in_specs,
        out_specs=out_specs,
        scratch_shapes=[pltpu.VMEM((M, D), jnp.bfloat16)],
        compiler_params=pltpu.CompilerParams(
            dimension_semantics=("parallel", "arbitrary"),   # batch blocks ||, layers seq.
            vmem_limit_bytes=48 * 1024 * 1024),
    )(x_flat, *weights)


# ----------------------------------------------------------------------------
# Positional embedding (token embedding + sinusoidal positions) — JAX glue.
# ----------------------------------------------------------------------------
def sinusoidal_positional_encoding(max_len, d_model):
    pos = jnp.arange(max_len, dtype=jnp.float32)[:, None]
    i = jnp.arange(d_model, dtype=jnp.float32)[None, :]
    angle_rates = 1.0 / jnp.power(10000.0, (2.0 * jnp.floor(i / 2.0)) / d_model)
    angles = pos * angle_rates
    even = (jnp.arange(d_model) % 2) == 0
    return jnp.where(even[None, :], jnp.sin(angles), jnp.cos(angles))


def encoder_forward(tokens, params, num_heads, d_model, seqs_per_block=None):
    B, S = tokens.shape
    # embedding gather + positional add (glue, plain JAX; gather is not the hot path)
    y = params["embedding"][tokens] * jnp.sqrt(jnp.float32(d_model))
    y = y + params["pos_enc"][:S][None, :, :]
    # TODO(synk): nn.Dropout — identity at inference (eval mode), not implemented.
    y = y.reshape(B * S, d_model)
    y = encoder_stack(y, params, num_heads, S, B, seqs_per_block)
    return y.reshape(B, S, d_model)


# ----------------------------------------------------------------------------
# Deterministic parameter initialization (stacked per-layer weights).
# ----------------------------------------------------------------------------
def init_params(key, vocab_size, d_model, num_heads, d_ff, num_encoders, seq_len):
    del num_heads
    scale = 0.02
    keys = iter(jax.random.split(key, 1 + 6 * num_encoders))

    def nrm(shape):
        return scale * jax.random.normal(next(keys), shape, dtype=jnp.float32)

    emb = nrm((vocab_size, d_model))
    L = num_encoders
    wq = nrm((L, d_model, d_model))
    wk = nrm((L, d_model, d_model))
    wv = nrm((L, d_model, d_model))
    wo = nrm((L, d_model, d_model))
    w1 = nrm((L, d_model, d_ff))
    w2 = nrm((L, d_ff, d_model))

    zeros_d = jnp.zeros((L, 1, d_model), jnp.float32)
    params = {
        "embedding": emb,
        "pos_enc": sinusoidal_positional_encoding(seq_len, d_model),
        # fused QKV projection weight/bias; matmul weights stored in bf16 for the MXU
        "wqkv": jnp.concatenate([wq, wk, wv], axis=2).astype(jnp.bfloat16),
        "bqkv": jnp.zeros((L, 1, 3 * d_model), jnp.float32),
        "wo": wo.astype(jnp.bfloat16),
        "bo": zeros_d,
        "ln1_g": jnp.ones((L, 1, d_model), jnp.float32),
        "ln1_b": zeros_d,
        "w1": w1.astype(jnp.bfloat16),
        "b1": jnp.zeros((L, 1, d_ff), jnp.float32),
        "w2": w2.astype(jnp.bfloat16),
        "b2": zeros_d,
        "ln2_g": jnp.ones((L, 1, d_model), jnp.float32),
        "ln2_b": zeros_d,
    }
    return params


# ----------------------------------------------------------------------------
if __name__ == "__main__":
    vocab_size = 50
    d_model = 32
    num_heads = 4
    d_ff = 64
    dropout_prob = 0.0
    num_encoders = 2
    input_seq_length = 8
    batch = 2

    key = jax.random.PRNGKey(0)
    pkey, tkey = jax.random.split(key)
    params = init_params(pkey, vocab_size, d_model, num_heads, d_ff,
                         num_encoders, input_seq_length)
    tokens = jax.random.randint(tkey, (batch, input_seq_length), 0, vocab_size,
                                dtype=jnp.int32)

    # seqs_per_block=1 exercises the parallel batch-block grid axis (2 blocks).
    out = encoder_forward(tokens, params, num_heads, d_model, seqs_per_block=1)
    out = jax.block_until_ready(out)
    assert out.shape == (batch, input_seq_length, d_model)
    assert bool(jnp.all(jnp.isfinite(out)))
    print("KERNEL_OK")
</pallas_src>

<mosaic_0001>
module attributes {stable_mosaic.version = 11 : i64} {
  func.func @encoder_stack_kernel(%arg0: i32, %arg1: i32, %arg2: memref<8x32xf32, #tpu.memory_space<vmem>>, %arg3: memref<1x32x96xbf16, #tpu.memory_space<vmem>>, %arg4: memref<1x1x96xf32, #tpu.memory_space<vmem>>, %arg5: memref<1x32x32xbf16, #tpu.memory_space<vmem>>, %arg6: memref<1x1x32xf32, #tpu.memory_space<vmem>>, %arg7: memref<1x1x32xf32, #tpu.memory_space<vmem>>, %arg8: memref<1x1x32xf32, #tpu.memory_space<vmem>>, %arg9: memref<1x32x64xbf16, #tpu.memory_space<vmem>>, %arg10: memref<1x1x64xf32, #tpu.memory_space<vmem>>, %arg11: memref<1x64x32xbf16, #tpu.memory_space<vmem>>, %arg12: memref<1x1x32xf32, #tpu.memory_space<vmem>>, %arg13: memref<1x1x32xf32, #tpu.memory_space<vmem>>, %arg14: memref<1x1x32xf32, #tpu.memory_space<vmem>>, %arg15: memref<8x32xf32, #tpu.memory_space<vmem>>, %arg16: memref<8x32xbf16, #tpu.memory_space<vmem>>) attributes {dimension_semantics = [#tpu.dimension_semantics<parallel>, #tpu.dimension_semantics<arbitrary>], iteration_bounds = array<i64: 2, 2>, scalar_prefetch = 0 : i64, scratch_operands = 1 : i64, tpu.core_type = #tpu.core_type<tc>, window_params = [{transform_indices = @transform_0, window_bounds = array<i64: 8, 32>}, {transform_indices = @transform_1, window_bounds = array<i64: 1, 32, 96>}, {transform_indices = @transform_2, window_bounds = array<i64: 1, 1, 96>}, {transform_indices = @transform_3, window_bounds = array<i64: 1, 32, 32>}, {transform_indices = @transform_4, window_bounds = array<i64: 1, 1, 32>}, {transform_indices = @transform_5, window_bounds = array<i64: 1, 1, 32>}, {transform_indices = @transform_6, window_bounds = array<i64: 1, 1, 32>}, {transform_indices = @transform_7, window_bounds = array<i64: 1, 32, 64>}, {transform_indices = @transform_8, window_bounds = array<i64: 1, 1, 64>}, {transform_indices = @transform_9, window_bounds = array<i64: 1, 64, 32>}, {transform_indices = @transform_10, window_bounds = array<i64: 1, 1, 32>}, {transform_indices = @transform_11, window_bounds = array<i64: 1, 1, 32>}, {transform_indices = @transform_12, window_bounds = array<i64: 1, 1, 32>}, {transform_indices = @transform_13, window_bounds = array<i64: 8, 32>}]} {
    %c0_i32 = arith.constant 0 : i32
    %0 = arith.cmpi eq, %arg1, %c0_i32 : i32
    %1 = arith.extui %0 : i1 to i32
    %c0_i32_0 = arith.constant 0 : i32
    %2 = arith.cmpi ne, %1, %c0_i32_0 : i32
    scf.if %2 {
      %c0_78 = arith.constant 0 : index
      %c0_79 = arith.constant 0 : index
      %183 = vector.load %arg2[%c0_78, %c0_79] : memref<8x32xf32, #tpu.memory_space<vmem>>, vector<8x32xf32>
      %c0_80 = arith.constant 0 : index
      %c0_81 = arith.constant 0 : index
      %184 = vector.load %arg15[%c0_80, %c0_81] : memref<8x32xf32, #tpu.memory_space<vmem>>, vector<8x32xf32>
      tpu.vector_store %arg15[%c0_80, %c0_81], %183 {strides = array<i32>} : memref<8x32xf32, #tpu.memory_space<vmem>>, vector<8x32xf32>,
    } else {
    }
    %c0 = arith.constant 0 : index
    %c0_1 = arith.constant 0 : index
    %3 = vector.load %arg15[%c0, %c0_1] : memref<8x32xf32, #tpu.memory_space<vmem>>, vector<8x32xf32>
    %4 = arith.truncf %3 : vector<8x32xf32> to vector<8x32xbf16>
    %c0_2 = arith.constant 0 : index
    %c0_3 = arith.constant 0 : index
    %c0_4 = arith.constant 0 : index
    %5 = vector.load %arg3[%c0_2, %c0_3, %c0_4] : memref<1x32x96xbf16, #tpu.memory_space<vmem>>, vector<1x32x96xbf16>
    %6 = vector.shape_cast %5 : vector<1x32x96xbf16> to vector<32x96xbf16>
    %cst = arith.constant dense<0.000000e+00> : vector<8x96xf32>
    %7 = tpu.matmul %4, %6, %cst {dimension_numbers = #tpu.dot_dimension_numbers<[1], [0], [0], [1], [0, 0, 1, 1], [], []>} : vector<8x32xbf16>, vector<32x96xbf16>, vector<8x96xf32> -> vector<8x96xf32>
    %c0_5 = arith.constant 0 : index
    %c0_6 = arith.constant 0 : index
    %c0_7 = arith.constant 0 : index
    %8 = vector.load %arg4[%c0_5, %c0_6, %c0_7] : memref<1x1x96xf32, #tpu.memory_space<vmem>>, vector<1x1x96xf32>
    %9 = vector.shape_cast %8 : vector<1x1x96xf32> to vector<1x96xf32>
    %10 = vector.broadcast %9 : vector<1x96xf32> to vector<8x96xf32>
    %11 = arith.addf %7, %10 : vector<8x96xf32>
    %12 = vector.shape_cast %11 : vector<8x96xf32> to vector<1x8x96xf32>
    %13 = vector.extract_strided_slice %12 {offsets = [0, 0, 0], sizes = [1, 8, 32], strides = [1, 1, 1]} : vector<1x8x96xf32> to vector<1x8x32xf32>
    %cst_8 = arith.constant 0.353553385 : f32
    %14 = vector.broadcast %cst_8 : f32 to vector<1x8x32xf32>
    %15 = arith.mulf %13, %14 : vector<1x8x32xf32>
    %16 = vector.extract_strided_slice %12 {offsets = [0, 0, 32], sizes = [1, 8, 32], strides = [1, 1, 1]} : vector<1x8x96xf32> to vector<1x8x32xf32>
    %17 = vector.extract_strided_slice %12 {offsets = [0, 0, 64], sizes = [1, 8, 32], strides = [1, 1, 1]} : vector<1x8x96xf32> to vector<1x8x32xf32>
    %18 = vector.extract_strided_slice %15 {offsets = [0, 0, 0], sizes = [1, 8, 8], strides = [1, 1, 1]} : vector<1x8x32xf32> to vector<1x8x8xf32>
    %19 = arith.truncf %18 : vector<1x8x8xf32> to vector<1x8x8xbf16>
    %20 = vector.extract_strided_slice %16 {offsets = [0, 0, 0], sizes = [1, 8, 8], strides = [1, 1, 1]} : vector<1x8x32xf32> to vector<1x8x8xf32>
    %21 = arith.truncf %20 : vector<1x8x8xf32> to vector<1x8x8xbf16>
    %22 = vector.extract_strided_slice %17 {offsets = [0, 0, 0], sizes = [1, 8, 8], strides = [1, 1, 1]} : vector<1x8x32xf32> to vector<1x8x8xf32>
    %23 = arith.truncf %22 : vector<1x8x8xf32> to vector<1x8x8xbf16>
    "tpu.trace_start"() <{level = 10 : i32, message = "bqd,bkd->bqk"}> : () -> ()
    %cst_9 = arith.constant dense<0.000000e+00> : vector<1x8x8xf32>
    %24 = tpu.matmul %19, %21, %cst_9 {dimension_numbers = #tpu.dot_dimension_numbers<[2], [2], [1], [1], [0, 0, 0, 1, 1, 1], [0], [0]>} : vector<1x8x8xbf16>, vector<1x8x8xbf16>, vector<1x8x8xf32> -> vector<1x8x8xf32>
    "tpu.trace_stop"() : () -> ()
    %cst_10 = arith.constant dense<0xFF800000> : vector<1x8xf32>
    %25 = vector.multi_reduction <maximumf>, %24, %cst_10 [2] : vector<1x8x8xf32> to vector<1x8xf32>
    %26 = vector.shape_cast %25 : vector<1x8xf32> to vector<1x8x1xf32>
    %27 = vector.broadcast %26 : vector<1x8x1xf32> to vector<1x8x8xf32>
    %28 = arith.subf %24, %27 : vector<1x8x8xf32>
    %29 = math.exp %28 : vector<1x8x8xf32>
    %cst_11 = arith.constant dense<0.000000e+00> : vector<1x8xf32>
    %30 = vector.multi_reduction <add>, %29, %cst_11 [2] : vector<1x8x8xf32> to vector<1x8xf32>
    %31 = vector.shape_cast %30 : vector<1x8xf32> to vector<1x8x1xf32>
    %32 = vector.broadcast %31 : vector<1x8x1xf32> to vector<1x8x8xf32>
    %33 = arith.divf %29, %32 : vector<1x8x8xf32>
    %34 = arith.truncf %33 : vector<1x8x8xf32> to vector<1x8x8xbf16>
    "tpu.trace_start"() <{level = 10 : i32, message = "bqk,bkd->bqd"}> : () -> ()
    %cst_12 = arith.constant dense<0.000000e+00> : vector<1x8x8xf32>
    %35 = tpu.matmul %34, %23, %cst_12 {dimension_numbers = #tpu.dot_dimension_numbers<[2], [1], [1], [2], [0, 0, 0, 1, 1, 2], [0], [0]>} : vector<1x8x8xbf16>, vector<1x8x8xbf16>, vector<1x8x8xf32> -> vector<1x8x8xf32>
    "tpu.trace_stop"() : () -> ()
    %36 = vector.shape_cast %35 : vector<1x8x8xf32> to vector<8x8xf32>
    %37 = arith.truncf %36 : vector<8x8xf32> to vector<8x8xbf16>
    %c0_13 = arith.constant 0 : index
    %c0_14 = arith.constant 0 : index
    %38 = vector.load %arg16[%c0_13, %c0_14] : memref<8x32xbf16, #tpu.memory_space<vmem>>, vector<8x8xbf16>
    tpu.vector_store %arg16[%c0_13, %c0_14], %37 {strides = array<i32>} : memref<8x32xbf16, #tpu.memory_space<vmem>>, vector<8x8xbf16>,
    %39 = vector.extract_strided_slice %15 {offsets = [0, 0, 8], sizes = [1, 8, 8], strides = [1, 1, 1]} : vector<1x8x32xf32> to vector<1x8x8xf32>
    %40 = arith.truncf %39 : vector<1x8x8xf32> to vector<1x8x8xbf16>
    %41 = vector.extract_strided_slice %16 {offsets = [0, 0, 8], sizes = [1, 8, 8], strides = [1, 1, 1]} : vector<1x8x32xf32> to vector<1x8x8xf32>
    %42 = arith.truncf %41 : vector<1x8x8xf32> to vector<1x8x8xbf16>
    %43 = vector.extract_strided_slice %17 {offsets = [0, 0, 8], sizes = [1, 8, 8], strides = [1, 1, 1]} : vector<1x8x32xf32> to vector<1x8x8xf32>
    %44 = arith.truncf %43 : vector<1x8x8xf32> to vector<1x8x8xbf16>
    "tpu.trace_start"() <{level = 10 : i32, message = "bqd,bkd->bqk"}> : () -> ()
    %cst_15 = arith.constant dense<0.000000e+00> : vector<1x8x8xf32>
    %45 = tpu.matmul %40, %42, %cst_15 {dimension_numbers = #tpu.dot_dimension_numbers<[2], [2], [1], [1], [0, 0, 0, 1, 1, 1], [0], [0]>} : vector<1x8x8xbf16>, vector<1x8x8xbf16>, vector<1x8x8xf32> -> vector<1x8x8xf32>
    "tpu.trace_stop"() : () -> ()
    %cst_16 = arith.constant dense<0xFF800000> : vector<1x8xf32>
    %46 = vector.multi_reduction <maximumf>, %45, %cst_16 [2] : vector<1x8x8xf32> to vector<1x8xf32>
    %47 = vector.shape_cast %46 : vector<1x8xf32> to vector<1x8x1xf32>
    %48 = vector.broadcast %47 : vector<1x8x1xf32> to vector<1x8x8xf32>
    %49 = arith.subf %45, %48 : vector<1x8x8xf32>
    %50 = math.exp %49 : vector<1x8x8xf32>
    %cst_17 = arith.constant dense<0.000000e+00> : vector<1x8xf32>
    %51 = vector.multi_reduction <add>, %50, %cst_17 [2] : vector<1x8x8xf32> to vector<1x8xf32>
    %52 = vector.shape_cast %51 : vector<1x8xf32> to vector<1x8x1xf32>
    %53 = vector.broadcast %52 : vector<1x8x1xf32> to vector<1x8x8xf32>
    %54 = arith.divf %50, %53 : vector<1x8x8xf32>
    %55 = arith.truncf %54 : vector<1x8x8xf32> to vector<1x8x8xbf16>
    "tpu.trace_start"() <{level = 10 : i32, message = "bqk,bkd->bqd"}> : () -> ()
    %cst_18 = arith.constant dense<0.000000e+00> : vector<1x8x8xf32>
    %56 = tpu.matmul %55, %44, %cst_18 {dimension_numbers = #tpu.dot_dimension_numbers<[2], [1], [1], [2], [0, 0, 0, 1, 1, 2], [0], [0]>} : vector<1x8x8xbf16>, vector<1x8x8xbf16>, vector<1x8x8xf32> -> vector<1x8x8xf32>
    "tpu.trace_stop"() : () -> ()
    %57 = vector.shape_cast %56 : vector<1x8x8xf32> to vector<8x8xf32>
    %58 = arith.truncf %57 : vector<8x8xf32> to vector<8x8xbf16>
    %c0_19 = arith.constant 0 : index
    %c8 = arith.constant 8 : index
    %59 = vector.load %arg16[%c0_19, %c8] : memref<8x32xbf16, #tpu.memory_space<vmem>>, vector<8x8xbf16>
    tpu.vector_store %arg16[%c0_19, %c8], %58 {strides = array<i32>} : memref<8x32xbf16, #tpu.memory_space<vmem>>, vector<8x8xbf16>,
    %60 = vector.extract_strided_slice %15 {offsets = [0, 0, 16], sizes = [1, 8, 8], strides = [1, 1, 1]} : vector<1x8x32xf32> to vector<1x8x8xf32>
    %61 = arith.truncf %60 : vector<1x8x8xf32> to vector<1x8x8xbf16>
    %62 = vector.extract_strided_slice %16 {offsets = [0, 0, 16], sizes = [1, 8, 8], strides = [1, 1, 1]} : vector<1x8x32xf32> to vector<1x8x8xf32>
    %63 = arith.truncf %62 : vector<1x8x8xf32> to vector<1x8x8xbf16>
    %64 = vector.extract_strided_slice %17 {offsets = [0, 0, 16], sizes = [1, 8, 8], strides = [1, 1, 1]} : vector<1x8x32xf32> to vector<1x8x8xf32>
    %65 = arith.truncf %64 : vector<1x8x8xf32> to vector<1x8x8xbf16>
    "tpu.trace_start"() <{level = 10 : i32, message = "bqd,bkd->bqk"}> : () -> ()
    %cst_20 = arith.constant dense<0.000000e+00> : vector<1x8x8xf32>
    %66 = tpu.matmul %61, %63, %cst_20 {dimension_numbers = #tpu.dot_dimension_numbers<[2], [2], [1], [1], [0, 0, 0, 1, 1, 1], [0], [0]>} : vector<1x8x8xbf16>, vector<1x8x8xbf16>, vector<1x8x8xf32> -> vector<1x8x8xf32>
    "tpu.trace_stop"() : () -> ()
    %cst_21 = arith.constant dense<0xFF800000> : vector<1x8xf32>
    %67 = vector.multi_reduction <maximumf>, %66, %cst_21 [2] : vector<1x8x8xf32> to vector<1x8xf32>
    %68 = vector.shape_cast %67 : vector<1x8xf32> to vector<1x8x1xf32>
    %69 = vector.broadcast %68 : vector<1x8x1xf32> to vector<1x8x8xf32>
    %70 = arith.subf %66, %69 : vector<1x8x8xf32>
    %71 = math.exp %70 : vector<1x8x8xf32>
    %cst_22 = arith.constant dense<0.000000e+00> : vector<1x8xf32>
    %72 = vector.multi_reduction <add>, %71, %cst_22 [2] : vector<1x8x8xf32> to vector<1x8xf32>
    %73 = vector.shape_cast %72 : vector<1x8xf32> to vector<1x8x1xf32>
    %74 = vector.broadcast %73 : vector<1x8x1xf32> to vector<1x8x8xf32>
    %75 = arith.divf %71, %74 : vector<1x8x8xf32>
    %76 = arith.truncf %75 : vector<1x8x8xf32> to vector<1x8x8xbf16>
    "tpu.trace_start"() <{level = 10 : i32, message = "bqk,bkd->bqd"}> : () -> ()
    %cst_23 = arith.constant dense<0.000000e+00> : vector<1x8x8xf32>
    %77 = tpu.matmul %76, %65, %cst_23 {dimension_numbers = #tpu.dot_dimension_numbers<[2], [1], [1], [2], [0, 0, 0, 1, 1, 2], [0], [0]>} : vector<1x8x8xbf16>, vector<1x8x8xbf16>, vector<1x8x8xf32> -> vector<1x8x8xf32>
    "tpu.trace_stop"() : () -> ()
    %78 = vector.shape_cast %77 : vector<1x8x8xf32> to vector<8x8xf32>
    %79 = arith.truncf %78 : vector<8x8xf32> to vector<8x8xbf16>
    %c0_24 = arith.constant 0 : index
    %c16 = arith.constant 16 : index
    %80 = vector.load %arg16[%c0_24, %c16] : memref<8x32xbf16, #tpu.memory_space<vmem>>, vector<8x8xbf16>
    tpu.vector_store %arg16[%c0_24, %c16], %79 {strides = array<i32>} : memref<8x32xbf16, #tpu.memory_space<vmem>>, vector<8x8xbf16>,
    %81 = vector.extract_strided_slice %15 {offsets = [0, 0, 24], sizes = [1, 8, 8], strides = [1, 1, 1]} : vector<1x8x32xf32> to vector<1x8x8xf32>
    %82 = arith.truncf %81 : vector<1x8x8xf32> to vector<1x8x8xbf16>
    %83 = vector.extract_strided_slice %16 {offsets = [0, 0, 24], sizes = [1, 8, 8], strides = [1, 1, 1]} : vector<1x8x32xf32> to vector<1x8x8xf32>
    %84 = arith.truncf %83 : vector<1x8x8xf32> to vector<1x8x8xbf16>
    %85 = vector.extract_strided_slice %17 {offsets = [0, 0, 24], sizes = [1, 8, 8], strides = [1, 1, 1]} : vector<1x8x32xf32> to vector<1x8x8xf32>
    %86 = arith.truncf %85 : vector<1x8x8xf32> to vector<1x8x8xbf16>
    "tpu.trace_start"() <{level = 10 : i32, message = "bqd,bkd->bqk"}> : () -> ()
    %cst_25 = arith.constant dense<0.000000e+00> : vector<1x8x8xf32>
    %87 = tpu.matmul %82, %84, %cst_25 {dimension_numbers = #tpu.dot_dimension_numbers<[2], [2], [1], [1], [0, 0, 0, 1, 1, 1], [0], [0]>} : vector<1x8x8xbf16>, vector<1x8x8xbf16>, vector<1x8x8xf32> -> vector<1x8x8xf32>
    "tpu.trace_stop"() : () -> ()
    %cst_26 = arith.constant dense<0xFF800000> : vector<1x8xf32>
    %88 = vector.multi_reduction <maximumf>, %87, %cst_26 [2] : vector<1x8x8xf32> to vector<1x8xf32>
    %89 = vector.shape_cast %88 : vector<1x8xf32> to vector<1x8x1xf32>
    %90 = vector.broadcast %89 : vector<1x8x1xf32> to vector<1x8x8xf32>
    %91 = arith.subf %87, %90 : vector<1x8x8xf32>
    %92 = math.exp %91 : vector<1x8x8xf32>
    %cst_27 = arith.constant dense<0.000000e+00> : vector<1x8xf32>
    %93 = vector.multi_reduction <add>, %92, %cst_27 [2] : vector<1x8x8xf32> to vector<1x8xf32>
    %94 = vector.shape_cast %93 : vector<1x8xf32> to vector<1x8x1xf32>
    %95 = vector.broadcast %94 : vector<1x8x1xf32> to vector<1x8x8xf32>
    %96 = arith.divf %92, %95 : vector<1x8x8xf32>
    %97 = arith.truncf %96 : vector<1x8x8xf32> to vector<1x8x8xbf16>
    "tpu.trace_start"() <{level = 10 : i32, message = "bqk,bkd->bqd"}> : () -> ()
    %cst_28 = arith.constant dense<0.000000e+00> : vector<1x8x8xf32>
    %98 = tpu.matmul %97, %86, %cst_28 {dimension_numbers = #tpu.dot_dimension_numbers<[2], [1], [1], [2], [0, 0, 0, 1, 1, 2], [0], [0]>} : vector<1x8x8xbf16>, vector<1x8x8xbf16>, vector<1x8x8xf32> -> vector<1x8x8xf32>
    "tpu.trace_stop"() : () -> ()
    %99 = vector.shape_cast %98 : vector<1x8x8xf32> to vector<8x8xf32>
    %100 = arith.truncf %99 : vector<8x8xf32> to vector<8x8xbf16>
    %c0_29 = arith.constant 0 : index
    %c24 = arith.constant 24 : index
    %101 = vector.load %arg16[%c0_29, %c24] : memref<8x32xbf16, #tpu.memory_space<vmem>>, vector<8x8xbf16>
    tpu.vector_store %arg16[%c0_29, %c24], %100 {strides = array<i32>} : memref<8x32xbf16, #tpu.memory_space<vmem>>, vector<8x8xbf16>,
    %c0_30 = arith.constant 0 : index
    %c0_31 = arith.constant 0 : index
    %102 = vector.load %arg16[%c0_30, %c0_31] : memref<8x32xbf16, #tpu.memory_space<vmem>>, vector<8x32xbf16>
    %c0_32 = arith.constant 0 : index
    %c0_33 = arith.constant 0 : index
    %c0_34 = arith.constant 0 : index
    %103 = vector.load %arg5[%c0_32, %c0_33, %c0_34] : memref<1x32x32xbf16, #tpu.memory_space<vmem>>, vector<1x32x32xbf16>
    %104 = vector.shape_cast %103 : vector<1x32x32xbf16> to vector<32x32xbf16>
    %cst_35 = arith.constant dense<0.000000e+00> : vector<8x32xf32>
    %105 = tpu.matmul %102, %104, %cst_35 {dimension_numbers = #tpu.dot_dimension_numbers<[1], [0], [0], [1], [0, 0, 1, 1], [], []>} : vector<8x32xbf16>, vector<32x32xbf16>, vector<8x32xf32> -> vector<8x32xf32>
    %c0_36 = arith.constant 0 : index
    %c0_37 = arith.constant 0 : index
    %c0_38 = arith.constant 0 : index
    %106 = vector.load %arg6[%c0_36, %c0_37, %c0_38] : memref<1x1x32xf32, #tpu.memory_space<vmem>>, vector<1x1x32xf32>
    %107 = vector.shape_cast %106 : vector<1x1x32xf32> to vector<1x32xf32>
    %108 = vector.broadcast %107 : vector<1x32xf32> to vector<8x32xf32>
    %109 = arith.addf %105, %108 : vector<8x32xf32>
    %110 = arith.addf %3, %109 : vector<8x32xf32>
    %c0_39 = arith.constant 0 : index
    %c0_40 = arith.constant 0 : index
    %c0_41 = arith.constant 0 : index
    %111 = vector.load %arg7[%c0_39, %c0_40, %c0_41] : memref<1x1x32xf32, #tpu.memory_space<vmem>>, vector<1x1x32xf32>
    %112 = vector.shape_cast %111 : vector<1x1x32xf32> to vector<1x32xf32>
    %c0_42 = arith.constant 0 : index
    %c0_43 = arith.constant 0 : index
    %c0_44 = arith.constant 0 : index
    %113 = vector.load %arg8[%c0_42, %c0_43, %c0_44] : memref<1x1x32xf32, #tpu.memory_space<vmem>>, vector<1x1x32xf32>
    %114 = vector.shape_cast %113 : vector<1x1x32xf32> to vector<1x32xf32>
    %cst_45 = arith.constant dense<0.000000e+00> : vector<8xf32>
    %115 = vector.multi_reduction <add>, %110, %cst_45 [1] : vector<8x32xf32> to vector<8xf32>
    %116 = vector.shape_cast %115 : vector<8xf32> to vector<8x1xf32>
    %cst_46 = arith.constant 3.200000e+01 : f32
    %117 = vector.broadcast %cst_46 : f32 to vector<8x1xf32>
    %118 = arith.divf %116, %117 : vector<8x1xf32>
    %119 = vector.broadcast %118 : vector<8x1xf32> to vector<8x32xf32>
    %120 = arith.subf %110, %119 : vector<8x32xf32>
    %121 = arith.mulf %120, %120 : vector<8x32xf32>
    %cst_47 = arith.constant dense<0.000000e+00> : vector<8xf32>
    %122 = vector.multi_reduction <add>, %121, %cst_47 [1] : vector<8x32xf32> to vector<8xf32>
    %123 = vector.shape_cast %122 : vector<8xf32> to vector<8x1xf32>
    %cst_48 = arith.constant 3.200000e+01 : f32
    %124 = vector.broadcast %cst_48 : f32 to vector<8x1xf32>
    %125 = arith.divf %123, %124 : vector<8x1xf32>
    %126 = vector.broadcast %118 : vector<8x1xf32> to vector<8x32xf32>
    %127 = arith.subf %110, %126 : vector<8x32xf32>
    %cst_49 = arith.constant 9.99999974E-6 : f32
    %128 = vector.broadcast %cst_49 : f32 to vector<8x1xf32>
    %129 = arith.addf %125, %128 : vector<8x1xf32>
    %130 = math.rsqrt %129 : vector<8x1xf32>
    %131 = vector.broadcast %130 : vector<8x1xf32> to vector<8x32xf32>
    %132 = arith.mulf %127, %131 : vector<8x32xf32>
    %133 = vector.broadcast %112 : vector<1x32xf32> to vector<8x32xf32>
    %134 = arith.mulf %132, %133 : vector<8x32xf32>
    %135 = vector.broadcast %114 : vector<1x32xf32> to vector<8x32xf32>
    %136 = arith.addf %134, %135 : vector<8x32xf32>
    %137 = arith.truncf %136 : vector<8x32xf32> to vector<8x32xbf16>
    %c0_50 = arith.constant 0 : index
    %c0_51 = arith.constant 0 : index
    %c0_52 = arith.constant 0 : index
    %138 = vector.load %arg9[%c0_50, %c0_51, %c0_52] : memref<1x32x64xbf16, #tpu.memory_space<vmem>>, vector<1x32x64xbf16>
    %139 = vector.shape_cast %138 : vector<1x32x64xbf16> to vector<32x64xbf16>
    %cst_53 = arith.constant dense<0.000000e+00> : vector<8x64xf32>
    %140 = tpu.matmul %137, %139, %cst_53 {dimension_numbers = #tpu.dot_dimension_numbers<[1], [0], [0], [1], [0, 0, 1, 1], [], []>} : vector<8x32xbf16>, vector<32x64xbf16>, vector<8x64xf32> -> vector<8x64xf32>
    %c0_54 = arith.constant 0 : index
    %c0_55 = arith.constant 0 : index
    %c0_56 = arith.constant 0 : index
    %141 = vector.load %arg10[%c0_54, %c0_55, %c0_56] : memref<1x1x64xf32, #tpu.memory_space<vmem>>, vector<1x1x64xf32>
    %142 = vector.shape_cast %141 : vector<1x1x64xf32> to vector<1x64xf32>
    %143 = vector.broadcast %142 : vector<1x64xf32> to vector<8x64xf32>
    %144 = arith.addf %140, %143 : vector<8x64xf32>
    %cst_57 = arith.constant 0.000000e+00 : f32
    %145 = vector.broadcast %cst_57 : f32 to vector<8x64xf32>
    %146 = arith.maximumf %144, %145 : vector<8x64xf32>
    %147 = arith.truncf %146 : vector<8x64xf32> to vector<8x64xbf16>
    %c0_58 = arith.constant 0 : index
    %c0_59 = arith.constant 0 : index
    %c0_60 = arith.constant 0 : index
    %148 = vector.load %arg11[%c0_58, %c0_59, %c0_60] : memref<1x64x32xbf16, #tpu.memory_space<vmem>>, vector<1x64x32xbf16>
    %149 = vector.shape_cast %148 : vector<1x64x32xbf16> to vector<64x32xbf16>
    %cst_61 = arith.constant dense<0.000000e+00> : vector<8x32xf32>
    %150 = tpu.matmul %147, %149, %cst_61 {dimension_numbers = #tpu.dot_dimension_numbers<[1], [0], [0], [1], [0, 0, 1, 1], [], []>} : vector<8x64xbf16>, vector<64x32xbf16>, vector<8x32xf32> -> vector<8x32xf32>
    %c0_62 = arith.constant 0 : index
    %c0_63 = arith.constant 0 : index
    %c0_64 = arith.constant 0 : index
    %151 = vector.load %arg12[%c0_62, %c0_63, %c0_64] : memref<1x1x32xf32, #tpu.memory_space<vmem>>, vector<1x1x32xf32>
    %152 = vector.shape_cast %151 : vector<1x1x32xf32> to vector<1x32xf32>
    %153 = vector.broadcast %152 : vector<1x32xf32> to vector<8x32xf32>
    %154 = arith.addf %150, %153 : vector<8x32xf32>
    %155 = arith.addf %136, %154 : vector<8x32xf32>
    %c0_65 = arith.constant 0 : index
    %c0_66 = arith.constant 0 : index
    %c0_67 = arith.constant 0 : index
    %156 = vector.load %arg13[%c0_65, %c0_66, %c0_67] : memref<1x1x32xf32, #tpu.memory_space<vmem>>, vector<1x1x32xf32>
    %157 = vector.shape_cast %156 : vector<1x1x32xf32> to vector<1x32xf32>
    %c0_68 = arith.constant 0 : index
    %c0_69 = arith.constant 0 : index
    %c0_70 = arith.constant 0 : index
    %158 = vector.load %arg14[%c0_68, %c0_69, %c0_70] : memref<1x1x32xf32, #tpu.memory_space<vmem>>, vector<1x1x32xf32>
    %159 = vector.shape_cast %158 : vector<1x1x32xf32> to vector<1x32xf32>
    %cst_71 = arith.constant dense<0.000000e+00> : vector<8xf32>
    %160 = vector.multi_reduction <add>, %155, %cst_71 [1] : vector<8x32xf32> to vector<8xf32>
    %161 = vector.shape_cast %160 : vector<8xf32> to vector<8x1xf32>
    %cst_72 = arith.constant 3.200000e+01 : f32
    %162 = vector.broadcast %cst_72 : f32 to vector<8x1xf32>
    %163 = arith.divf %161, %162 : vector<8x1xf32>
    %164 = vector.broadcast %163 : vector<8x1xf32> to vector<8x32xf32>
    %165 = arith.subf %155, %164 : vector<8x32xf32>
    %166 = arith.mulf %165, %165 : vector<8x32xf32>
    %cst_73 = arith.constant dense<0.000000e+00> : vector<8xf32>
    %167 = vector.multi_reduction <add>, %166, %cst_73 [1] : vector<8x32xf32> to vector<8xf32>
    %168 = vector.shape_cast %167 : vector<8xf32> to vector<8x1xf32>
    %cst_74 = arith.constant 3.200000e+01 : f32
    %169 = vector.broadcast %cst_74 : f32 to vector<8x1xf32>
    %170 = arith.divf %168, %169 : vector<8x1xf32>
    %171 = vector.broadcast %163 : vector<8x1xf32> to vector<8x32xf32>
    %172 = arith.subf %155, %171 : vector<8x32xf32>
    %cst_75 = arith.constant 9.99999974E-6 : f32
    %173 = vector.broadcast %cst_75 : f32 to vector<8x1xf32>
    %174 = arith.addf %170, %173 : vector<8x1xf32>
    %175 = math.rsqrt %174 : vector<8x1xf32>
    %176 = vector.broadcast %175 : vector<8x1xf32> to vector<8x32xf32>
    %177 = arith.mulf %172, %176 : vector<8x32xf32>
    %178 = vector.broadcast %157 : vector<1x32xf32> to vector<8x32xf32>
    %179 = arith.mulf %177, %178 : vector<8x32xf32>
    %180 = vector.broadcast %159 : vector<1x32xf32> to vector<8x32xf32>
    %181 = arith.addf %179, %180 : vector<8x32xf32>
    %c0_76 = arith.constant 0 : index
    %c0_77 = arith.constant 0 : index
    %182 = vector.load %arg15[%c0_76, %c0_77] : memref<8x32xf32, #tpu.memory_space<vmem>>, vector<8x32xf32>
    tpu.vector_store %arg15[%c0_76, %c0_77], %181 {strides = array<i32>} : memref<8x32xf32, #tpu.memory_space<vmem>>, vector<8x32xf32>,
    return
  }
  func.func @transform_0(%arg0: i32, %arg1: i32) -> (i32, i32) {
    %c0_i32 = arith.constant 0 : i32
    %c0_i32_0 = arith.constant 0 : i32
    return %arg0, %c0_i32 : i32, i32
  }
  func.func @transform_1(%arg0: i32, %arg1: i32) -> (i32, i32, i32) {
    %c0_i32 = arith.constant 0 : i32
    %c0_i32_0 = arith.constant 0 : i32
    %c0_i32_1 = arith.constant 0 : i32
    return %arg1, %c0_i32, %c0_i32_0 : i32, i32, i32
  }
  func.func @transform_2(%arg0: i32, %arg1: i32) -> (i32, i32, i32) {
    %c0_i32 = arith.constant 0 : i32
    %c0_i32_0 = arith.constant 0 : i32
    %c0_i32_1 = arith.constant 0 : i32
    return %arg1, %c0_i32, %c0_i32_0 : i32, i32, i32
  }
  func.func @transform_3(%arg0: i32, %arg1: i32) -> (i32, i32, i32) {
    %c0_i32 = arith.constant 0 : i32
    %c0_i32_0 = arith.constant 0 : i32
    %c0_i32_1 = arith.constant 0 : i32
    return %arg1, %c0_i32, %c0_i32_0 : i32, i32, i32
  }
  func.func @transform_4(%arg0: i32, %arg1: i32) -> (i32, i32, i32) {
    %c0_i32 = arith.constant 0 : i32
    %c0_i32_0 = arith.constant 0 : i32
    %c0_i32_1 = arith.constant 0 : i32
    return %arg1, %c0_i32, %c0_i32_0 : i32, i32, i32
  }
  func.func @transform_5(%arg0: i32, %arg1: i32) -> (i32, i32, i32) {
    %c0_i32 = arith.constant 0 : i32
    %c0_i32_0 = arith.constant 0 : i32
    %c0_i32_1 = arith.constant 0 : i32
    return %arg1, %c0_i32, %c0_i32_0 : i32, i32, i32
  }
  func.func @transform_6(%arg0: i32, %arg1: i32) -> (i32, i32, i32) {
    %c0_i32 = arith.constant 0 : i32
    %c0_i32_0 = arith.constant 0 : i32
    %c0_i32_1 = arith.constant 0 : i32
    return %arg1, %c0_i32, %c0_i32_0 : i32, i32, i32
  }
  func.func @transform_7(%arg0: i32, %arg1: i32) -> (i32, i32, i32) {
    %c0_i32 = arith.constant 0 : i32
    %c0_i32_0 = arith.constant 0 : i32
    %c0_i32_1 = arith.constant 0 : i32
    return %arg1, %c0_i32, %c0_i32_0 : i32, i32, i32
  }
  func.func @transform_8(%arg0: i32, %arg1: i32) -> (i32, i32, i32) {
    %c0_i32 = arith.constant 0 : i32
    %c0_i32_0 = arith.constant 0 : i32
    %c0_i32_1 = arith.constant 0 : i32
    return %arg1, %c0_i32, %c0_i32_0 : i32, i32, i32
  }
  func.func @transform_9(%arg0: i32, %arg1: i32) -> (i32, i32, i32) {
    %c0_i32 = arith.constant 0 : i32
    %c0_i32_0 = arith.constant 0 : i32
    %c0_i32_1 = arith.constant 0 : i32
    return %arg1, %c0_i32, %c0_i32_0 : i32, i32, i32
  }
  func.func @transform_10(%arg0: i32, %arg1: i32) -> (i32, i32, i32) {
    %c0_i32 = arith.constant 0 : i32
    %c0_i32_0 = arith.constant 0 : i32
    %c0_i32_1 = arith.constant 0 : i32
    return %arg1, %c0_i32, %c0_i32_0 : i32, i32, i32
  }
  func.func @transform_11(%arg0: i32, %arg1: i32) -> (i32, i32, i32) {
    %c0_i32 = arith.constant 0 : i32
    %c0_i32_0 = arith.constant 0 : i32
    %c0_i32_1 = arith.constant 0 : i32
    return %arg1, %c0_i32, %c0_i32_0 : i32, i32, i32
  }
  func.func @transform_12(%arg0: i32, %arg1: i32) -> (i32, i32, i32) {
    %c0_i32 = arith.constant 0 : i32
    %c0_i32_0 = arith.constant 0 : i32
    %c0_i32_1 = arith.constant 0 : i32
    return %arg1, %c0_i32, %c0_i32_0 : i32, i32, i32
  }
  func.func @transform_13(%arg0: i32, %arg1: i32) -> (i32, i32) {
    %c0_i32 = arith.constant 0 : i32
    %c0_i32_0 = arith.constant 0 : i32
    return %arg0, %c0_i32 : i32, i32
  }
}

</mosaic_0001>

<bundles_post_ra>
// kernel: tpu_custom_call.1
= control target key start
LH: loop header
LB: loop body
LE: loop exit
PB: predicated region body
PF: predicated region fallthrough
CT: control target
= control target key end

     0   :  { %s2574_s0 = inlined_call_operand.hbm [shape: f32[16,32], index: 0, kind: input, shape index: {}]   ;;  %s2575_s1 = inlined_call_operand.vmem [shape: bf16[2,32,96], index: 1, kind: input, shape index: {}]   ;;  %s2576_s2 = inlined_call_operand.vmem [shape: f32[2,1,96], index: 2, kind: input, shape index: {}]   ;;  %s2577_s3 = inlined_call_operand.vmem [shape: bf16[2,32,32], index: 3, kind: input, shape index: {}]   ;;  %s2578_s4 = inlined_call_operand.vmem [shape: f32[2,1,32], index: 4, kind: input, shape index: {}]   ;;  %s2579_s5 = inlined_call_operand.vmem [shape: f32[2,1,32], index: 5, kind: input, shape index: {}]   ;;  %s2580_s6 = inlined_call_operand.vmem [shape: f32[2,1,32], index: 6, kind: input, shape index: {}]   ;;  %s2581_s7 = inlined_call_operand.vmem [shape: bf16[2,32,64], index: 7, kind: input, shape index: {}]   ;;  %s2582_s8 = inlined_call_operand.vmem [shape: f32[2,1,64], index: 8, kind: input, shape index: {}]   ;;  %s2583_s9 = inlined_call_operand.vmem [shape: bf16[2,64,32], index: 9, kind: input, shape index: {}]   ;;  %s2584_s10 = inlined_call_operand.vmem [shape: f32[2,1,32], index: 10, kind: input, shape index: {}]   ;;  %s2585_s11 = inlined_call_operand.vmem [shape: f32[2,1,32], index: 11, kind: input, shape index: {}]   ;;  %s2586_s12 = inlined_call_operand.vmem [shape: f32[2,1,32], index: 12, kind: input, shape index: {}]   ;;  %s2587_s13 = inlined_call_operand.hbm [shape: f32[16,32], index: 13, kind: output, shape index: {}]  }
   0x1   :  { %2601 = sst [smem:[#allocation22_spill]] %s2574_s0 }
   0x2   :  { %2602 = sst [smem:[#allocation23_spill]] %s2575_s1 }
   0x3   :  { %2603 = sst [smem:[#allocation24_spill]] %s2577_s3 }
   0x4   :  { %2604 = sst [smem:[#allocation25_spill]] %s2580_s6 }
   0x5   :  { %2605 = sst [smem:[#allocation26_spill]] %s2581_s7 }
   0x6   :  { %2606 = sst [smem:[#allocation27_spill]] %s2584_s10 }
   0x7   :  { %2607 = sst [smem:[#allocation28_spill]] %s2585_s11 }
   0x8   :  { %2608 = sst [smem:[#allocation29_spill]] %s2586_s12 }
   0x9   :  { %2609 = sst [smem:[#allocation30_spill]] %s2587_s13 }
   0xa   :  { %18 = vsyncpa [#allocation4], 0 }
   0xb   :  { %20 = vsyncpa [#allocation4 + $0x1], 0 }
   0xc   :  { %21 = vsyncpa [#allocation5], 0 }
   0xd   :  { %23 = vsyncpa [#allocation5 + $0x1], 0  ;;  %s2222_s25 = smov 0   ;;  %s2224_s26 = smov 0  }
   0xe   :  { %s2226_s27 = smov 0   ;;  %s2228_s28 = smov 0  }
   0xf   :  { %s2230_s29 = smov 0   ;;  %s2232_s30 = smov 0  }
  0x10   :  { %s2234_s14 = smov 0   ;;  %s2236_s15 = smov 0  }
  0x11 LB: > { %2610 = sst [smem:[#allocation9_spill]] %s2104_s25  ;;  %s1708_s16 = sadd.s32 4294967295, %s2132_s15   ;;  %s2132_s15 = sphi %s2236_s15, %s29_s15   ;;  %s2128_s14 = sphi %s2234_s14, %s2659_s14   ;;  %s2124_s30 = sphi %s2232_s30, %s2658_s30   ;;  %s2120_s29 = sphi %s2230_s29, %s2657_s29   ;;  %s2116_s28 = sphi %s2228_s28, %s2656_s28   ;;  %s2112_s27 = sphi %s2226_s27, %s2655_s27   ;;  %s2108_s26 = sphi %s2224_s26, %s2654_s26   ;;  %s2104_s25 = sphi %s2222_s25, %s2653_s25  }
  0x12   : > { %2611 = sst [smem:[#allocation10_spill]] %s2108_s26  ;;  %s1709_s17 = sadd.s32 4294967294, %s2132_s15  }
  0x13   : > { %2612 = sst [smem:[#allocation11_spill]] %s2112_s27  ;;  %s38_s18 = sadd.s32 1, %s2124_s30 }
  0x14   : > { %2613 = sst [smem:[#allocation12_spill]] %s2120_s29  ;;  %s41_s19 = sadd.s32 1, %s2128_s14 }
  0x15   : > { %2614 = sst [smem:[#allocation13_spill]] %s2124_s30  ;;  %p39_p0 = scmp.ge.s32.totalorder %s38_s18, 2 }
  0x16   : > { %2615 = sst [smem:[#allocation14_spill]] %s2128_s14  ;;  %s48_s20 = sadd.s32 1, %s2112_s27 }
  0x17   : > { %2616 = sst [smem:[#allocation15_spill]] %s2132_s15  ;;  %p55_p1 = scmp.ne.s32.totalorder %s2112_s27, %s2108_s26 }
  0x18   : > { %p56_p2 = scmp.eq.s32.totalorder %s2132_s15, 0  ;;  %s2661_s18 = smov (%p39_p0, %s38_s18), 0 }
  0x19   : > { %2617 = sst [smem:[#allocation16_spill]] %s2661_s18  ;;  %s2663_s19 = smov (!%p39_p0, %s41_s19), %s2128_s14 }
  0x1a   : > { %p2273_p3 = por %p56_p2, %p55_p1  ;;  %p61_p4 = scmp.ne.s32.totalorder %s2108_s26, %s2104_s25 }
  0x1b   : > { %p43_p5 = scmp.ge.s32.totalorder %s2663_s19, 2  ;;  %p62_p6 = scmp.eq.s32.totalorder %s1708_s16, 0 }
  0x1c   : > { %p397_p7 = scmp.eq.s32.totalorder %s1708_s16, 3  ;;  %p403_p8 = scmp.eq.s32.totalorder %s1709_s17, 3 }
  0x1d   : > { %s2665_s19 = smov (%p43_p5, %s2663_s19), 0  ;;  %p2281_p9 = por %p62_p6, %p61_p4 }
  0x1e   : > { %2619 = sst [smem:[#allocation17_spill]] %s2665_s19  ;;  %p2285_p10 = por %p397_p7, %p55_p1 }
  0x1f   : > { %s45_s24 = ssub.s32 %s2128_s14, %s2665_s19  ;;  %p2291_p11 = por %p403_p8, %p61_p4 }
  0x20   : > { %s2621_s23 = scalar_select %p2285_p10, 1, 0 }
  0x21   : > { %s2623_s18 = scalar_select %p2291_p11, 1, 0 }
  0x22   : > { %2622 = sst [smem:[#allocation18_spill]] %s2621_s23  ;;  %p46_p12 = scmp.eq.s32.totalorder %s45_s24, 0 }
  0x23   : > { %2624 = sst [smem:[#allocation19_spill]] %s2623_s18  ;;  %p1896_p13 = scmp.lt.s32.totalorder %s2132_s15, 4 }
  0x24   : > { %s423_s16 = sand.u32 1, %s2112_s27   ;;  %s1713_s25 = sshll.u32 %s2128_s14, 7 }
  0x25   : > { %s2298_s17 = scalar_select %p46_p12, %s2112_s27, %s48_s20  }
  0x26   : > { %s1712_s30 = sshll.u32 %s423_s16, 3  ;;  %s2626_s0 = sld [smem:[#allocation22_spill]] }
  0x27   : > { %2625 = sst [smem:[#allocation20_spill]] %s2298_s17  ;;  %s427_s11 = scalar_lea.vmem [#allocation3], %s1712_s30 }
  0x28   : > { %s434_s10 = sshll.u32 %s427_s11, 4  ;;  %p2306_p0 = pnand %p1896_p13, %p2273_p3  ;;  %s435_s10 = int_to_ptr.vmem [resolvable:$true] %s434_s10 }
  0x29   : > { %p1714_p1 = scmp.ge.s32.totalorder %s2132_s15, 1  ;;  %p519_p2 = scmp.lt.s32.totalorder %s2132_s15, 5 }
  0x2a   : > { %s424_s24 = scalar_lea.sflag [#allocation4], %s423_s16  ;;  %p2010_p4 = pneg %p2306_p0 }
  0x2b   : > { %s2021_s20 = scalar_lea.vmem %s435_s10, 128  ;;  %s2134_s13 = smov [#allocation3]  }
  0x2c   : > { %s432_s12 = scalar_lea.hbm %s2626_s0, %s1713_s25  ;;  %p2022_p5 = scmp.ne.s32.totalorder %s435_s10, %s2021_s20 }
  0x2d   : > { %s2026_s25 = sshll.u32 %s2134_s13, 4  ;;  %s2027_s25 = int_to_ptr.vmem [resolvable:$false] %s2026_s25 }
  0x2e   : > { %p2024_p6 = pnand %p2022_p5, %p2010_p4  ;;  %s2028_s11 = scalar_lea.vmem %s2027_s25, 256 }
  0x2f   : > { %p2029_p8 = scmp.lt.s32.totalorder %s435_s10, %s2027_s25  ;;  %p2030_p12 = scmp.lt.s32.totalorder %s2028_s11, %s2021_s20 }
  0x30   : > { %p2025_p7 = pneg %p2024_p6 }
  0x31   : > { %p2031_p3 = por %p2030_p12, %p2029_p8 }
  0x33   : > { %p2032_p13 = pnand %p2031_p3, %p2025_p7 }
  0x35   : > { %2035 = shalt.err (!%p2032_p13)
}
  0x36   : > { %1891 = dma.hbm_to_vmem [thread:$0]  (!%p2306_p0), %s432_s12, 128, %s435_s10, %s424_s24  }
  0x37   : > { %p520_p11 = pnand %p1714_p1, %p519_p2 }
  0x39   : > { %523 = sbr.rel (%p520_p11) target bundleno = 2523 (0x9db), region = 72 }
  0x3e   : > { %s2321_s29 = sand.u32 1, %s2108_s26  }
  0x3f   : > { %2628 = sst [smem:[#allocation21_spill]] %s2321_s29  ;;  %s1715_s30 = sshll.u32 %s2321_s29, 3 }
  0x40   : > { %s526_s21 = scalar_lea.sflag [#allocation4], %s2321_s29  ;;  %s529_s16 = scalar_lea.vmem [#allocation3], %s1715_s30 }
  0x41   : > { %2095 = dma.done.wait (%p2281_p9), %s526_s21, 128  }
  0x42   : > { %2097 = vsyncadd (%p2281_p9), %s526_s21, 4294967168  ;;  %p616_p0 = scmp.lt.s32.totalorder %s2116_s28, 1  ;;  %s2629_s1 = sld [smem:[#allocation23_spill]] }
  0x43   : > { %s2630_s3 = sld [smem:[#allocation24_spill]]  ;;  %s2385_s11 = scalar_lea.vmem [#allocation6], %s1715_s30 }
  0x44   : > { %s2331_s10 = scalar_select %p616_p0, %s2116_s28, 1 }
  0x45   : > { %s2632_s7 = sld [smem:[#allocation26_spill]]  ;;  %p1725_p9 = scmp.ne.s32.totalorder %s2116_s28, 0 }
  0x46   : > { %s1763_s12 = sshll.u32 %s2331_s10, 4  ;;  %s2633_s15 = sld [smem:[#allocation27_spill]] }
  0x47   : > { %s2634_s29 = sld [smem:[#allocation28_spill]] }
  0x48   : > { %s620_s25 = scalar_lea.vmem %s2629_s1, %s1763_s12  ;;  %s645_s1 = scalar_lea.vmem %s2582_s8, %s2331_s10 }
  0x49   : > { %s2344_s0 = scalar_lea.vmem %s2630_s3, %s1763_s12  ;;  %s1766_s3 = sshll.u32 %s2331_s10, 5 }
  0x4a   : > { %s2371_s27 = scalar_lea.vmem %s2583_s9, %s1766_s3 }
  0x4b   : > { %s2361_s13 = scalar_lea.vmem %s2632_s7, %s1763_s12  ;;  %s2635_s7 = sld [smem:[#allocation29_spill]] }
  0x4c   : > { %s653_s23 = scalar_lea.vmem %s2633_s15, %s2331_s10 }
  0x4d   : > { %s656_s22 = scalar_lea.vmem %s2634_s29, %s2331_s10  ;;  %664 = sbr.rel (%p1725_p9) target bundleno = 84 (0x54), region = 80 }
  0x51   : > { %s659_s6 = scalar_lea.vmem %s2635_s7, %s2331_s10 }
  0x52   : > { %v665_v0 = vld [vmem:[%s529_s16] sm:$0xff]  ;;  %vm666_vm0 = vcmask 261120  }
  0x53   : > { %667 = vst.msk [vmem:[%s2385_s11] sm:$0xff] %vm666_vm0, %v665_v0 }
  0x54 PF: > { %v1978_v1 = vld [vmem:[%s620_s25 + $0x8] sm:$0xff]   ;;  %v2135_v2 = vmov 0.0   ;;  %v1979_v3 = vld [vmem:[%s620_s25] sm:$0xff]   ;;  %vm2136_vm1 = vmmov 0   ;;  %vm693_vm2 = vcmask 261120   ;;  %s2636_s28 = scalar_lea.vmem %s2576_s2, %s2331_s10  ;;  %s2137_s15 = smov 96  }
  0x55   : > { %1800 = vmatprep.subr.bf16.mxu0 %v2135_v2  ;;  %1808 = vmatprep.subr.bf16.mxu1 %v2135_v2  ;;  %v1726_v6 = vld [vmem:[%s2636_s28] ss:$0 sm:$0xff]  ;;  %s2138_s29 = smov 120   ;;  %s2139_s30 = smov 88   ;;  %vm743_vm3 = vcmask 64512   ;;  %vm807_vm4 = vcmask 1043456  }
  0x56   : > { %1801 = vmatpush3.bf16.msra.mxu0 %v1978_v1  ;;  %1804 = vmatprep.mubr.msk.bf16.mxu0 %vm2136_vm1, %v2135_v2  ;;  %s2140_s16 = smov 80   ;;  %s2141_s25 = smov 112   ;;  %vm852_vm5 = vcmask 60416   ;;  %vm972_vm6 = vcmask 126016   ;;  %vm1091_vm7 = vcmask 191616   ;;  %vm1210_vm8 = vcmask 257216  }
  0x57   : > { %1802 = vmatprep.subr.bf16.mxu0 %v2135_v2  ;;  %1810 = vmatprep.mubr.msk.bf16.mxu1 %vm2136_vm1, %v2135_v2  ;;  %s2142_s24 = smov 72   ;;  %s2143_s21 = smov 104   ;;  %vm1418_vm9 = vcmask 523264  }
  0x58   : > { %s2144_s14 = smov 56   ;;  %s2145_s17 = smov 64  }
  0x59   : > { %s2146_s26 = smov 40   ;;  %s2147_s18 = smov 48  }
  0x5a   : > { %v2394_v4 = vld [vmem:[%s2385_s11] sm:$0xff]  ;;  %1803 = vmatpush3.bf16.msra.mxu0 %v1979_v3  ;;  %s2148_s19 = smov 8   ;;  %s2149_s12 = smov 16  }
  0x5b   : > { %v669_v5 = vpack.c.bf16 %v2394_v4, %v2394_v4  ;;  %1814 = vmatprep.subr.bf16.mxu0 %v2135_v2  ;;  %s2150_s20 = smov 24   ;;  %s2637_s7 = scalar_lea.vmem %s2578_s4, %s2331_s10 }
  0x5d   : > { %1805 = vmatmul.mubr.msk.bf16.vlgmr.msra.gmra.mxu0 %vm693_vm2, %v669_v5 }
  0x5e   : > { %1816 = vmatprep.mubr.msk.bf16.mxu0 %vm2136_vm1, %v2135_v2 }
 0x11d   : > { %v731_v7 = vpop.f32.mrf.mxu0 }
 0x11e   : > { %v732_v8 = vadd.f32 %v1726_v6, %v731_v7 }
 0x11f   : > { %v1806_v9 = vpop.f32.mrf.mxu0 }
 0x120   : > { %v737_v10 = vmul.f32 0.35355338, %v732_v8  ;;  %v2410_v11 = vpack.c.bf16 %v732_v8, %v732_v8 }
 0x121   : > { %v734_v12 = vpop.f32.mrf.mxu0 }
 0x122   : > { %v738_v13 = vpack.c.bf16 %v737_v10, %v737_v10  ;;  %741 = vrot.lane.b32.xlu0 %v2410_v11, %s2137_s15  ;;  %s2638_s15 = scalar_lea.vmem %s2579_s5, %s2331_s10 }
 0x123   : > { %v1807_v14 = vpop.f32.mrf.mxu0 }
 0x124   : > { %855 = vrot.lane.b32.xlu1 %v738_v13, %s2138_s29  ;;  %s2647_s29 = sld [smem:[#allocation30_spill]] }
 0x126   : > { %857 = vrot.lane.b32.xlu0 %v2410_v11, %s2139_s30 }
 0x128   : > { %976 = vrot.lane.b32.xlu1 %v2410_v11, %s2140_s16  ;;  %s2639_s16 = sld [smem:[#allocation25_spill]] }
 0x12a   : > { %974 = vrot.lane.b32.xlu0 %v738_v13, %s2141_s25 }
 0x12c   : > { %1095 = vrot.lane.b32.xlu1 %v2410_v11, %s2142_s24 }
 0x12e   : > { %1093 = vrot.lane.b32.xlu0 %v738_v13, %s2143_s21  ;;  %s2640_s25 = scalar_lea.vmem %s2639_s16, %s2331_s10  ;;  %s2648_s16 = smov %s2647_s29 }
 0x194   : > { %v742_v15 = vpop.permute.xlu0 %741 }
 0x195   : > { %v748_v16 = vsel %vm743_vm3, %v742_v15, 0 }
 0x196   : > { %1809 = vmatpush3.bf16.xpose.msra.mxu1 %v748_v16  ;;  %v856_v18 = vpop.permute.xlu1 %855 }
 0x197   : > { %1820 = vmatprep.subr.bf16.mxu1 %v2135_v2 }
 0x198   : > { %v858_v17 = vpop.permute.xlu0 %857 }
 0x199   : > { %v863_v19 = vsel %vm743_vm3, %v858_v17, 0 }
 0x19a   : > { %v977_v20 = vpop.permute.xlu1 %976 }
 0x19b   : > { %v982_v21 = vsel %vm743_vm3, %v977_v20, 0 }
 0x19c   : > { %v975_v23 = vpop.permute.xlu0 %974 }
 0x19d   : > { %1811 = vmatmul.mubr.msk.bf16.vlgmr.msra.gmra.mxu1 %vm743_vm3, %v738_v13 }
 0x19e   : > { %1821 = vmatpush3.bf16.xpose.msra.mxu1 %v863_v19  ;;  %1822 = vmatprep.mubr.msk.bf16.mxu1 %vm2136_vm1, %v2135_v2  ;;  %v1096_v22 = vpop.permute.xlu1 %1095 }
 0x19f   : > { %1832 = vmatprep.subr.bf16.mxu1 %v2135_v2  ;;  %v1101_v24 = vsel %vm743_vm3, %v1096_v22, 0 }
 0x1a0   : > { %v1094_v25 = vpop.permute.xlu0 %1093 }
 0x1a5   : > { %1823 = vmatmul.mubr.msk.bf16.vlgmr.msra.gmra.mxu1 %vm743_vm3, %v856_v18 }
 0x1a6   : > { %1833 = vmatpush3.bf16.xpose.msra.mxu1 %v982_v21  ;;  %1834 = vmatprep.mubr.msk.bf16.mxu1 %vm2136_vm1, %v2135_v2 }
 0x1a7   : > { %1844 = vmatprep.subr.bf16.mxu1 %v2135_v2 }
 0x1ad   : > { %1835 = vmatmul.mubr.msk.bf16.vlgmr.msra.gmra.mxu1 %vm743_vm3, %v975_v23 }
 0x1ae   : > { %1845 = vmatpush3.bf16.xpose.msra.mxu1 %v1101_v24  ;;  %1846 = vmatprep.mubr.msk.bf16.mxu1 %vm2136_vm1, %v2135_v2 }
 0x1af   : > { %1856 = vmatprep.subr.bf16.mxu1 %v2135_v2 }
 0x1b5   : > { %1847 = vmatmul.mubr.msk.bf16.vlgmr.msra.gmra.mxu1 %vm743_vm3, %v1094_v25 }
 0x1b6   : > { %1860 = vmatprep.mubr.msk.bf16.mxu1 %vm2136_vm1, %v2135_v2 }
 0x25d   : > { %v784_v26 = vpop.f32.mrf.mxu1 }
 0x25e   : > { %v790_v27 = vsel %vm743_vm3, %v784_v26, -inf }
 0x25f   : > { %791 = vmax.xlane.f32.xlu1 %v790_v27  ;;  %v1812_v28 = vpop.f32.mrf.mxu1 }
 0x261   : > { %v787_v29 = vpop.f32.mrf.mxu1 }
 0x263   : > { %v1813_v30 = vpop.f32.mrf.mxu1 }
 0x265   : > { %v899_v31 = vpop.f32.mrf.mxu1 }
 0x266   : > { %v905_v32 = vsel %vm743_vm3, %v899_v31, -inf }
 0x267   : > { %906 = vmax.xlane.f32.xlu0 %v905_v32  ;;  %v1824_v33 = vpop.f32.mrf.mxu1 }
 0x269   : > { %v902_v34 = vpop.f32.mrf.mxu1 }
 0x26b   : > { %v1825_v35 = vpop.f32.mrf.mxu1 }
 0x26d   : > { %v1018_v36 = vpop.f32.mrf.mxu1 }
 0x26e   : > { %v1024_v37 = vsel %vm743_vm3, %v1018_v36, -inf }
 0x26f   : > { %1025 = vmax.xlane.f32.xlu0 %v1024_v37  ;;  %v1836_v38 = vpop.f32.mrf.mxu1 }
 0x270   : > { %v1980_v38 = vld [vmem:[%s2344_s0 + $0x8] sm:$0xff]  }
 0x271   : > { %v1021_v39 = vpop.f32.mrf.mxu1  ;;  %1857 = vmatpush3.bf16.msra.mxu1 %v1980_v38 }
 0x272   : > { %1858 = vmatprep.subr.bf16.mxu1 %v2135_v2 }
 0x273   : > { %v1837_v40 = vpop.f32.mrf.mxu1 }
 0x275   : > { %v1137_v41 = vpop.f32.mrf.mxu1 }
 0x276   : > { %v1143_v42 = vsel %vm743_vm3, %v1137_v41, -inf }
 0x277   : > { %1144 = vmax.xlane.f32.xlu1 %v1143_v42  ;;  %v1848_v43 = vpop.f32.mrf.mxu1 }
 0x279   : > { %v1140_v44 = vpop.f32.mrf.mxu1 }
 0x27b   : > { %v1849_v45 = vpop.f32.mrf.mxu1 }
 0x2e8   : > { %v792_v46 = vpop.xlane.xlu1 %791 }
 0x2e9   : > { %v793_v47 = vsub.f32 %v784_v26, %v792_v46 }
 0x2eb   : > { %v794_v48 = vmul.f32 1.442695, %v793_v47 }
 0x2ed   : > { %1988 = vpow2.f32 %v794_v48 }
 0x2f0   : > { %v907_v49 = vpop.xlane.xlu0 %906 }
 0x2f1   : > { %v908_v50 = vsub.f32 %v899_v31, %v907_v49 }
 0x2f3   : > { %v909_v51 = vmul.f32 1.442695, %v908_v50 }
 0x2f5   : > { %1990 = vpow2.f32 %v909_v51 }
 0x2f8   : > { %v1026_v52 = vpop.xlane.xlu0 %1025 }
 0x2f9   : > { %v1027_v53 = vsub.f32 %v1018_v36, %v1026_v52 }
 0x2fa   : > { %v1989_v54 = vpop.eup %1988 }
 0x2fb   : > { %v1028_v55 = vmul.f32 1.442695, %v1027_v53  ;;  %v796_v56 = vsel %vm743_vm3, %v1989_v54, 0.0 }
 0x2fc   : > { %797 = vadd.xlane.f32.xlu0 %v796_v56 }
 0x2fd   : > { %1992 = vpow2.f32 %v1028_v55 }
 0x300   : > { %v1145_v61 = vpop.xlane.xlu1 %1144 }
 0x301   : > { %v1146_v62 = vsub.f32 %v1137_v41, %v1145_v61  ;;  %v1981_v41 = vld [vmem:[%s2344_s0] sm:$0xff]  }
 0x302   : > { %v1991_v57 = vpop.eup %1990  ;;  %1859 = vmatpush3.bf16.msra.mxu1 %v1981_v41 }
 0x303   : > { %v911_v58 = vsel %vm743_vm3, %v1991_v57, 0.0  ;;  %v1147_v63 = vmul.f32 1.442695, %v1146_v62  ;;  %1872 = vmatprep.subr.bf16.mxu1 %v2135_v2 }
 0x304   : > { %912 = vadd.xlane.f32.xlu1 %v911_v58 }
 0x305   : > { %1994 = vpow2.f32 %v1147_v63 }
 0x30a   : > { %v1993_v59 = vpop.eup %1992 }
 0x30b   : > { %v1030_v60 = vsel %vm743_vm3, %v1993_v59, 0.0 }
 0x30c   : > { %1031 = vadd.xlane.f32.xlu0 %v1030_v60 }
 0x312   : > { %v1995_v0 = vpop.eup %1994 }
 0x313   : > { %v1149_v1 = vsel %vm743_vm3, %v1995_v0, 0.0 }
 0x315   : > { %917 = vrot.lane.b32.xlu1 %v2410_v11, %s2144_s14 }
 0x322   : > { %802 = vrot.lane.b32.xlu0 %v2410_v11, %s2145_s17 }
 0x326   : > { %1155 = vrot.lane.b32.xlu0 %v2410_v11, %s2146_s26 }
 0x339   : > { %1150 = vadd.xlane.f32.xlu1 %v1149_v1 }
 0x34a   : > { %1036 = vrot.lane.b32.xlu1 %v2410_v11, %s2147_s18 }
 0x385   : > { %v798_v3 = vpop.xlane.xlu0 %797 }
 0x386   : > { %1996 = vrcp.f32 %v798_v3 }
 0x38d   : > { %v913_v5 = vpop.xlane.xlu1 %912 }
 0x38e   : > { %1998 = vrcp.f32 %v913_v5  ;;  %v1982_v5 = vld [vmem:[%s2361_s13 + $0x8] sm:$0xff]  }
 0x391   : > { %v918_v12 = vpop.permute.xlu1 %917 }
 0x392   : > { %v923_v15 = vsel %vm807_vm4, %v918_v12, 0 }
 0x393   : > { %v1997_v6 = vpop.eup %1996 }
 0x394   : > { %v800_v8 = vmul.f32 %v1997_v6, %v1989_v54  ;;  %v1741_v54 = vld [vmem:[%s2637_s7] ss:$0 sm:$0xff] }
 0x395   : > { %v1032_v7 = vpop.xlane.xlu0 %1031  ;;  %v1983_v6 = vld [vmem:[%s2361_s13] sm:$0xff]   ;;  %s1507_s13 = sshll.u32 %s2385_s11, 4  ;;  %s1508_s13 = int_to_ptr.vmem [resolvable:$true] %s1507_s13 }
 0x396   : > { %v801_v13 = vpack.c.bf16 %v800_v8, %v800_v8  ;;  %2000 = vrcp.f32 %v1032_v7  ;;  %v1985_v7 = vld [vmem:[%s2371_s27 + $0x10] sm:$0xff]   ;;  %s2036_s24 = scalar_lea.vmem %s1508_s13, 128 }
 0x397   : > { %p2037_p11 = scmp.ne.s32.totalorder %s1508_s13, %s2036_s24 }
 0x399   : > { %v803_v9 = vpop.permute.xlu0 %802  ;;  %p2038_p1 = pnand %p2037_p11, %p2285_p10 }
 0x39a   : > { %v809_v10 = vsel %vm807_vm4, %v803_v9, 0 }
 0x39b   : > { %1815 = vmatpush3.bf16.msra.mxu0 %v809_v10  ;;  %v1999_v14 = vpop.eup %1998  ;;  %p2039_p2 = pneg %p2038_p1 }
 0x39c   : > { %1826 = vmatprep.subr.bf16.mxu0 %v2135_v2  ;;  %v915_v11 = vmul.f32 %v1999_v14, %v1991_v57 }
 0x39d   : > { %v1156_v22 = vpop.permute.xlu0 %1155 }
 0x39e   : > { %1817 = vmatmul.mubr.msk.bf16.vlgmr.msra.gmra.mxu0 %vm743_vm3, %v801_v13  ;;  %v916_v16 = vpack.c.bf16 %v915_v11, %v915_v11  ;;  %v1161_v24 = vsel %vm807_vm4, %v1156_v22, 0  ;;  %v1745_v13 = vld [vmem:[%s2638_s15] ss:$0 sm:$0xff] }
 0x39f   : > { %1827 = vmatpush3.bf16.msra.mxu0 %v923_v15  ;;  %1828 = vmatprep.mubr.msk.bf16.mxu0 %vm2136_vm1, %v2135_v2  ;;  %v1746_v15 = vld [vmem:[%s2640_s25] ss:$0 sm:$0xff] }
 0x3a0   : > { %1838 = vmatprep.subr.bf16.mxu0 %v2135_v2 }
 0x3a3   : > { %v2001_v17 = vpop.eup %2000 }
 0x3a4   : > { %v1034_v19 = vmul.f32 %v2001_v17, %v1993_v59 }
 0x3a6   : > { %1829 = vmatmul.mubr.msk.bf16.vlgmr.msra.gmra.mxu0 %vm743_vm3, %v916_v16  ;;  %v1035_v23 = vpack.c.bf16 %v1034_v19, %v1034_v19  ;;  %v1987_v19 = vld [vmem:[%s2371_s27] sm:$0xff]  }
 0x3a7   : > { %1840 = vmatprep.mubr.msk.bf16.mxu0 %vm2136_vm1, %v2135_v2 }
 0x3c2   : > { %v1151_v18 = vpop.xlane.xlu1 %1150 }
 0x3c3   : > { %2002 = vrcp.f32 %v1151_v18  ;;  %v1986_v18 = vld [vmem:[%s2371_s27 + $0x8] sm:$0xff]  }
 0x3c6   : > { %v1037_v20 = vpop.permute.xlu1 %1036 }
 0x3c7   : > { %v1042_v21 = vsel %vm807_vm4, %v1037_v20, 0  ;;  %v1747_v20 = vld [vmem:[%s645_s1] ss:$0 sm:$0xff]  ;;  %s2642_s1 = sld [smem:[#allocation12_spill]] }
 0x3c8   : > { %1839 = vmatpush3.bf16.msra.mxu0 %v1042_v21 }
 0x3c9   : > { %1850 = vmatprep.subr.bf16.mxu0 %v2135_v2 }
 0x3cb   : > { %1841 = vmatmul.mubr.msk.bf16.vlgmr.msra.gmra.mxu0 %vm743_vm3, %v1035_v23 }
 0x3cc   : > { %1851 = vmatpush3.bf16.msra.mxu0 %v1161_v24  ;;  %1852 = vmatprep.mubr.msk.bf16.mxu0 %vm2136_vm1, %v2135_v2 }
 0x3cd   : > { %1864 = vmatprep.subr.bf16.mxu0 %v2135_v2  ;;  %s1760_s7 = sshll.u32 %s2642_s1, 7 }
 0x3ce   : > { %s1505_s30 = scalar_lea.hbm %s2647_s29, %s1760_s7 }
 0x3d0   : > { %v2003_v25 = vpop.eup %2002 }
 0x3d1   : > { %v1153_v26 = vmul.f32 %v2003_v25, %v1995_v0 }
 0x3d3   : > { %v1154_v27 = vpack.c.bf16 %v1153_v26, %v1153_v26 }
 0x3d5   : > { %1853 = vmatmul.mubr.msk.bf16.vlgmr.msra.gmra.mxu0 %vm743_vm3, %v1154_v27 }
 0x3d6   : > { %1868 = vmatprep.mubr.msk.bf16.mxu0 %vm2136_vm1, %v2135_v2  ;;  %1865 = vmatpush3.bf16.msra.mxu0 %v1982_v5 }
 0x3d7   : > { %1866 = vmatprep.subr.bf16.mxu0 %v2135_v2 }
 0x3da   : > { %1867 = vmatpush3.bf16.msra.mxu0 %v1983_v6 }
 0x45e   : > { %v845_v28 = vpop.f32.mrf.mxu0 }
 0x45f   : > { %v851_v29 = vpack.c.bf16 %v845_v28, %v845_v28 }
 0x460   : > { %v1818_v30 = vpop.f32.mrf.mxu0 }
 0x461   : > { %853 = vst.msk [vmem:[#allocation2] sm:$0xf] %vm852_vm5, %v851_v29 }
 0x462   : > { %v848_v31 = vpop.f32.mrf.mxu0 }
 0x464   : > { %v1819_v32 = vpop.f32.mrf.mxu0 }
 0x466   : > { %v959_v33 = vpop.f32.mrf.mxu0 }
 0x467   : > { %v1767_v34 = vpack.c.bf16 %v959_v33, %v959_v33 }
 0x468   : > { %v1830_v35 = vpop.f32.mrf.mxu0 }
 0x469   : > { %969 = vrot.lane.b32.xlu1 %v1767_v34, %s2148_s19 }
 0x46a   : > { %v962_v36 = vpop.f32.mrf.mxu0 }
 0x46c   : > { %v1831_v37 = vpop.f32.mrf.mxu0 }
 0x48b   : > { %v1078_v39 = vpop.f32.mrf.mxu0 }
 0x48c   : > { %v1768_v40 = vpack.c.bf16 %v1078_v39, %v1078_v39 }
 0x48d   : > { %v1842_v42 = vpop.f32.mrf.mxu0 }
 0x48e   : > { %1088 = vrot.lane.b32.xlu0 %v1768_v40, %s2149_s12 }
 0x48f   : > { %v1081_v43 = vpop.f32.mrf.mxu0 }
 0x491   : > { %v1843_v44 = vpop.f32.mrf.mxu0 }
 0x492   : > { %v1757_v44 = vld [vmem:[%s656_s22] ss:$0 sm:$0xff]  ;;  %s2151_s22 = smov [#allocation6]  }
 0x493   : > { %s2040_s10 = sshll.u32 %s2151_s22, 4  ;;  %s2041_s10 = int_to_ptr.vmem [resolvable:$false] %s2040_s10 }
 0x494   : > { %p2043_p4 = scmp.lt.s32.totalorder %s1508_s13, %s2041_s10 }
 0x495   : > { %v1197_v45 = vpop.f32.mrf.mxu0 }
 0x496   : > { %v1769_v46 = vpack.c.bf16 %v1197_v45, %v1197_v45 }
 0x497   : > { %v1854_v47 = vpop.f32.mrf.mxu0 }
 0x498   : > { %1207 = vrot.lane.b32.xlu1 %v1769_v46, %s2150_s20  ;;  %v1758_v46 = vld [vmem:[%s659_s6] ss:$0 sm:$0xff]  ;;  %s2042_s6 = scalar_lea.vmem %s2041_s10, 256 }
 0x499   : > { %v1200_v48 = vpop.f32.mrf.mxu0  ;;  %p2044_p5 = scmp.lt.s32.totalorder %s2042_s6, %s2036_s24 }
 0x49b   : > { %v1855_v49 = vpop.f32.mrf.mxu0  ;;  %p2045_p6 = por %p2044_p5, %p2043_p4 }
 0x49d   : > { %p2046_p7 = pnand %p2045_p6, %p2039_p2 }
 0x4db   : > { %v970_v50 = vpop.permute.xlu1 %969 }
 0x4dc   : > { %973 = vst.msk [vmem:[#allocation2] sm:$0xf] %vm972_vm6, %v970_v50 }
 0x500   : > { %v1089_v51 = vpop.permute.xlu0 %1088 }
 0x501   : > { %1092 = vst.msk [vmem:[#allocation2] sm:$0xf] %vm1091_vm7, %v1089_v51 }
 0x50a   : > { %v1208_v52 = vpop.permute.xlu1 %1207 }
 0x50b   : > { %1211 = vst.msk [vmem:[#allocation2] sm:$0xf] %vm1210_vm8, %v1208_v52 }
 0x512   : > { %v1212_v53 = vld [vmem:[#allocation2] sm:$0xf] }
 0x513   : > { %1861 = vmatmul.mubr.msk.bf16.vlgmr.msra.gmra.mxu1 %vm693_vm2, %v1212_v53 }
 0x514   : > { %1880 = vmatprep.mubr.msk.bf16.mxu1 %vm2136_vm1, %v2135_v2 }
 0x5d3   : > { %v1273_v55 = vpop.f32.mrf.mxu1 }
 0x5d4   : > { %v1274_v56 = vadd.f32 %v1741_v54, %v1273_v55 }
 0x5d5   : > { %v1862_v57 = vpop.f32.mrf.mxu1 }
 0x5d6   : > { %v1279_v58 = vadd.f32 %v1274_v56, %v2394_v4  ;;  %v1984_v4 = vld [vmem:[%s2371_s27 + $0x18] sm:$0xff]   ;;  %s2643_s27 = sld [smem:[#allocation21_spill]] }
 0x5d7   : > { %v1276_v59 = vpop.f32.mrf.mxu1  ;;  %1873 = vmatpush3.bf16.msra.mxu1 %v1984_v4 }
 0x5d8   : > { %v1282_v60 = vsel %vm693_vm2, %v1279_v58, 0.0  ;;  %1874 = vmatprep.subr.bf16.mxu1 %v2135_v2 }
 0x5d9   : > { %1283 = vadd.xlane.f32.xlu0 %v1282_v60  ;;  %v1863_v61 = vpop.f32.mrf.mxu1 }
 0x5db   : > { %1875 = vmatpush3.bf16.msra.mxu1 %v1985_v7 }
 0x5dc   : > { %1876 = vmatprep.subr.bf16.mxu1 %v2135_v2  ;;  %s1494_s25 = scalar_lea.sflag [#allocation5], %s2643_s27 }
 0x5df   : > { %1877 = vmatpush3.bf16.msra.mxu1 %v1986_v18 }
 0x5e0   : > { %1878 = vmatprep.subr.bf16.mxu1 %v2135_v2  ;;  %v1751_v2 = vld [vmem:[%s653_s23] ss:$0 sm:$0xff] }
 0x5e3   : > { %1879 = vmatpush3.bf16.msra.mxu1 %v1987_v19 }
 0x662   : > { %v1284_v62 = vpop.xlane.xlu0 %1283 }
 0x663   : > { %v1286_v63 = vmul.f32 0.03125, %v1284_v62 }
 0x665   : > { %v1287_v0 = vsub.f32 %v1279_v58, %v1286_v63 }
 0x667   : > { %v1288_v1 = vmul.f32 %v1287_v0, %v1287_v0 }
 0x669   : > { %v1289_v3 = vsel %vm693_vm2, %v1288_v1, 0.0 }
 0x66a   : > { %1290 = vadd.xlane.f32.xlu1 %v1289_v3 }
 0x6f3   : > { %v1291_v8 = vpop.xlane.xlu1 %1290 }
 0x6f4   : > { %v1292_v9 = vmul.f32 0.03125, %v1291_v8 }
 0x6f6   : > { %v1293_v10 = vadd.f32 1e-05, %v1292_v9 }
 0x6f8   : > { %2004 = vrsqrt.f32 %v1293_v10 }
 0x705   : > { %v2005_v12 = vpop.eup %2004 }
 0x706   : > { %v1295_v14 = vmul.f32 %v2005_v12, %v1287_v0 }
 0x708   : > { %v1302_v11 = vmul.f32 %v1745_v13, %v1295_v14 }
 0x70a   : > { %v1309_v16 = vadd.f32 %v1746_v15, %v1302_v11 }
 0x70c   : > { %v1310_v17 = vpack.c.bf16 %v1309_v16, %v1309_v16 }
 0x70e   : > { %1869 = vmatmul.mubr.msk.bf16.vlgmr.msra.gmra.mxu0 %vm693_vm2, %v1310_v17 }
 0x7ce   : > { %v1371_v21 = vpop.f32.mrf.mxu0 }
 0x7cf   : > { %v1372_v22 = vadd.f32 %v1747_v20, %v1371_v21 }
 0x7d0   : > { %v1870_v23 = vpop.f32.mrf.mxu0 }
 0x7d1   : > { %v1377_v24 = vmax.f32 %v1372_v22, 0.0 }
 0x7d2   : > { %v1374_v25 = vpop.f32.mrf.mxu0 }
 0x7d3   : > { %v1378_v26 = vpack.c.bf16 %v1377_v24, %v1377_v24 }
 0x7d4   : > { %v1871_v27 = vpop.f32.mrf.mxu0 }
 0x7d5   : > { %1881 = vmatmul.mubr.msk.bf16.vlgmr.msra.gmra.mxu1 %vm1418_vm9, %v1378_v26 }
 0x895   : > { %v1456_v28 = vpop.f32.mrf.mxu1 }
 0x896   : > { %v1457_v29 = vadd.f32 %v1751_v2, %v1456_v28 }
 0x897   : > { %v1882_v30 = vpop.f32.mrf.mxu1 }
 0x898   : > { %v1462_v31 = vadd.f32 %v1457_v29, %v1309_v16 }
 0x899   : > { %v1459_v32 = vpop.f32.mrf.mxu1 }
 0x89a   : > { %v1465_v33 = vsel %vm693_vm2, %v1462_v31, 0.0 }
 0x89b   : > { %1466 = vadd.xlane.f32.xlu0 %v1465_v33  ;;  %v1883_v34 = vpop.f32.mrf.mxu1 }
 0x924   : > { %v1467_v35 = vpop.xlane.xlu0 %1466 }
 0x925   : > { %v1468_v36 = vmul.f32 0.03125, %v1467_v35 }
 0x927   : > { %v1469_v37 = vsub.f32 %v1462_v31, %v1468_v36 }
 0x929   : > { %v1470_v38 = vmul.f32 %v1469_v37, %v1469_v37 }
 0x92b   : > { %v1471_v39 = vsel %vm693_vm2, %v1470_v38, 0.0 }
 0x92c   : > { %1472 = vadd.xlane.f32.xlu0 %v1471_v39 }
 0x9b5   : > { %v1473_v40 = vpop.xlane.xlu0 %1472 }
 0x9b6   : > { %v1474_v41 = vmul.f32 0.03125, %v1473_v40 }
 0x9b8   : > { %v1475_v42 = vadd.f32 1e-05, %v1474_v41 }
 0x9ba   : > { %2006 = vrsqrt.f32 %v1475_v42 }
 0x9c7   : > { %v2007_v43 = vpop.eup %2006 }
 0x9c8   : > { %v1477_v45 = vmul.f32 %v2007_v43, %v1469_v37 }
 0x9ca   : > { %v1484_v47 = vmul.f32 %v1757_v44, %v1477_v45 }
 0x9cc   : > { %v1491_v48 = vadd.f32 %v1758_v46, %v1484_v47 }
 0x9ce   : > { %1492 = vst.msk [vmem:[%s2385_s11] sm:$0xff] %vm693_vm2, %v1491_v48 }
 0x9cf   : > { %2049 = shalt.err (!%p2046_p7)
}
 0x9d0   : > { %s2050_s21 = scalar_lea.hbm %s1505_s30, 128  ;;  %s2054_s17 = scalar_lea.hbm %s2648_s16, 256 }
 0x9d1   : > { %p2051_p8 = scmp.ne.s32.totalorder %s1505_s30, %s2050_s21  ;;  %p2055_p13 = scmp.lt.s32.totalorder %s1505_s30, %s2648_s16 }
 0x9d2   : > { %p2056_p0 = scmp.lt.s32.totalorder %s2054_s17, %s2050_s21 }
 0x9d3   : > { %p2052_p12 = pnand %p2051_p8, %p2285_p10 }
 0x9d4   : > { %p2057_p9 = por %p2056_p0, %p2055_p13 }
 0x9d5   : > { %p2053_p3 = pneg %p2052_p12 }
 0x9d7   : > { %p2058_p11 = pnand %p2057_p9, %p2053_p3 }
 0x9d9   : > { %2061 = shalt.err (!%p2058_p11)
}
 0x9da   : > { %1886 = dma.vmem_to_hbm [thread:$0]  (%p2285_p10), %s1508_s13, 128, %s1505_s30, %s1494_s25  }
 0x9db PF: > { %s2649_s27 = sld [smem:[#allocation15_spill]] }
 0x9dc   : > { %s2650_s18 = sld [smem:[#allocation9_spill]] }
 0x9dd   : > { %s2651_s19 = sld [smem:[#allocation19_spill]] }
 0x9e1   : > { %p1897_p1 = scmp.ge.s32.totalorder %s2649_s27, 2 }
 0x9e2   : > { %s1519_s12 = sand.u32 1, %s2650_s18  }
 0x9e3   : > { %p2652_p2 = scmp.ne.s32.totalorder %s2651_s19, 0  ;;  %s1520_s20 = scalar_lea.sflag [#allocation5], %s1519_s12 }
 0x9e5   : > { %p1893_p4 = pnand %p1897_p1, %p2652_p2 }
 0x9e7   : > { %p1894_p5 = pneg %p1893_p4 }
 0x9e9   : > { %2099 = dma.done.wait (%p1894_p5), %s1520_s20, 128  }
 0x9ea   : > { %2101 = vsyncadd (%p1894_p5), %s1520_s20, 4294967168  ;;  %s29_s15 = sadd.s32 1, %s2649_s27   ;;  %s2653_s25 = sld [smem:[#allocation10_spill]] }
 0x9eb   : > { %p26_p6 = scmp.ge.s32.totalorder %s29_s15, 6   ;;  %s2654_s26 = sld [smem:[#allocation11_spill]] }
 0x9ec   : > { %s2655_s27 = sld [smem:[#allocation20_spill]] }
 0x9ed   : > { %s2656_s28 = sld [smem:[#allocation13_spill]]  ;;  %28 = sbr.rel (!%p26_p6) target bundleno = 17 (0x11), region = 157 }
 0x9ee   : > { %s2657_s29 = sld [smem:[#allocation14_spill]] }
 0x9ef   : > { %s2658_s30 = sld [smem:[#allocation16_spill]] }
 0x9f0   : > { %s2659_s14 = sld [smem:[#allocation17_spill]] }
 0x9f2   :  { %1525 = vsyncpa [#allocation4], 1 }
 0x9f3   :  { %1527 = vsyncpa [#allocation4 + $0x1], 1 }
 0x9f4   :  { %1528 = vsyncpa [#allocation5], 1 }
 0x9f5   :  { %1530 = vsyncpa [#allocation5 + $0x1], 1 }

</bundles_post_ra>
